<compile_context>
chip_gen: v5e
topology: v5e:2x2
jax: 0.10.0
libtpu: 0.0.40
codegen_flags: <defaults>
</compile_context>

<pallas_src>
import jax
import jax.numpy as jnp
from jax.experimental import pallas as pl
from jax.experimental.pallas import tpu as pltpu

LANE = 128


def _round_up(x, m):
    return (x + m - 1) // m * m


def _pad_to(a, shape):
    return jnp.pad(a, [(0, t - s) for s, t in zip(a.shape, shape)])


def _choose_block_batch(B):
    """Adaptive batch tile: small path for action selection, else 2 even tiles."""
    if B <= 16:
        return 16  # single tiny tile; padding B=1..16 to 128 would waste ~8x work
    # Two even tiles: covers both TensorCores on v7x; a cheap 2-step loop on v5e/v6e.
    half = _round_up((B + 1) // 2, 16)
    return min(half, 1024)  # cap keeps blocks comfortably inside scoped VMEM everywhere


def qfunction_kernel(x_ref, w1_ref, b1_ref, w2_ref, b2_ref, w3_ref, b3_ref, o_ref):
    # Layer 1: Linear (MXU, f32 accumulate) + bias + ReLU (VPU)
    h = jnp.dot(x_ref[...], w1_ref[...], preferred_element_type=jnp.float32)
    h = jnp.maximum(h + b1_ref[...], 0.0)
    # Layer 2
    h = jnp.dot(h, w2_ref[...], preferred_element_type=jnp.float32)
    h = jnp.maximum(h + b2_ref[...], 0.0)
    # Layer 3 (Q-value head): (bm, hid_p) @ (hid_p, n_actions); masked n_actions-lane store
    q = jnp.dot(h, w3_ref[...], preferred_element_type=jnp.float32)
    o_ref[...] = (q + b3_ref[...]).astype(o_ref.dtype)


def prepare_params(w1, b1, w2, b2, w3, b3):
    """One-time (cacheable) padding of the hidden dim to 128 lanes.

    Padded hidden columns/rows are zero, so with ReLU(0)=0 the padded lanes stay exactly
    zero through the network and contribute nothing to q -> results are exact.
    """
    obs_size, hidden = w1.shape
    n_actions = w3.shape[1]
    hid_p = _round_up(hidden, LANE)
    w1_p = _pad_to(w1, (obs_size, hid_p))
    b1_p = _pad_to(b1.reshape(1, -1), (1, hid_p))
    w2_p = _pad_to(w2, (hid_p, hid_p))
    b2_p = _pad_to(b2.reshape(1, -1), (1, hid_p))
    w3_p = _pad_to(w3, (hid_p, n_actions))
    b3_p = b3.reshape(1, -1)
    return w1_p, b1_p, w2_p, b2_p, w3_p, b3_p


def qfunction_forward(x, padded_params, *, block_batch=None):
    """x: (B, obs_size) f32; padded_params from prepare_params(). Returns (B, n_actions) f32."""
    w1_p, b1_p, w2_p, b2_p, w3_p, b3_p = padded_params
    B, obs_size = x.shape
    hid_p = w1_p.shape[1]
    n_actions = w3_p.shape[1]

    if block_batch is None:
        block_batch = _choose_block_batch(B)
    b_p = _round_up(B, block_batch)
    x_p = x if b_p == B else _pad_to(x, (b_p, obs_size))  # no-op on aligned batches

    grid = (b_p // block_batch,)
    const = lambda shape: pl.BlockSpec(shape, lambda i: (0, 0))  # resident across batch tiles

    out = pl.pallas_call(
        qfunction_kernel,
        out_shape=jax.ShapeDtypeStruct((b_p, n_actions), jnp.float32),
        grid=grid,
        in_specs=[
            pl.BlockSpec((block_batch, obs_size), lambda i: (i, 0)),  # batch-tiled activations
            const((obs_size, hid_p)),
            const((1, hid_p)),
            const((hid_p, hid_p)),
            const((1, hid_p)),
            const((hid_p, n_actions)),
            const((1, n_actions)),
        ],
        out_specs=pl.BlockSpec((block_batch, n_actions), lambda i: (i, 0)),
        compiler_params=pltpu.CompilerParams(dimension_semantics=("parallel",)),
    )(x_p, w1_p, b1_p, w2_p, b2_p, w3_p, b3_p)

    return out if b_p == B else out[:B]


def init_params(key, obs_size, hidden, n_actions):
    # Deterministic synthetic init (mimics nn.Linear's uniform(-1/sqrt(in), 1/sqrt(in))).
    ks = jax.random.split(key, 6)

    def linear(kw, kb, fan_in, fan_out):
        bound = 1.0 / jnp.sqrt(float(fan_in))
        w = jax.random.uniform(kw, (fan_in, fan_out), jnp.float32, -bound, bound)
        b = jax.random.uniform(kb, (1, fan_out), jnp.float32, -bound, bound)
        return w, b

    w1, b1 = linear(ks[0], ks[1], obs_size, hidden)
    w2, b2 = linear(ks[2], ks[3], hidden, hidden)
    w3, b3 = linear(ks[4], ks[5], hidden, n_actions)
    return w1, b1, w2, b2, w3, b3


if __name__ == "__main__":
    # Shapes consistent with the module: obs vector -> hidden 100 -> n_actions.
    B = 256          # batch path: 2 even tiles of 128 (grid=2, parallel over v7x TCs)
    OBS_SIZE = 32    # env.observation_space[0].shape[0] (synthetic)
    HIDDEN = 100     # hidden_layer_n in the module
    N_ACTIONS = 8    # env.action_space[0].n (synthetic)

    key = jax.random.PRNGKey(0)
    kx, kp = jax.random.split(key)
    x = jax.random.normal(kx, (B, OBS_SIZE), jnp.float32)
    raw_params = init_params(kp, OBS_SIZE, HIDDEN, N_ACTIONS)
    padded_params = prepare_params(*raw_params)   # one-time, off the hot path

    q_values = qfunction_forward(x, padded_params)
    jax.block_until_ready(q_values)
    assert q_values.shape == (B, N_ACTIONS)

    # Pure-JAX f32 reference (tolerance covers XLA's default TPU matmul precision).
    w1, b1, w2, b2, w3, b3 = raw_params
    h = jnp.maximum(x @ w1 + b1, 0.0)
    h = jnp.maximum(h @ w2 + b2, 0.0)
    ref = h @ w3 + b3
    assert jnp.allclose(q_values, ref, atol=5e-2, rtol=5e-2), float(
        jnp.max(jnp.abs(q_values - ref)))

    # Small-batch action-selection path (B<=16 -> single 16-row tile, grid=1).
    q_small = qfunction_forward(x[:4], padded_params)
    jax.block_until_ready(q_small)
    assert q_small.shape == (4, N_ACTIONS)
    assert jnp.allclose(q_small, ref[:4], atol=5e-2, rtol=5e-2)

    # TODO(synk): pfrl.action_value.DiscreteActionValue is a thin wrapper object
    # (argmax/max helpers over q); the kernel returns the raw Q-value matrix.
    print("KERNEL_OK")
</pallas_src>

<mosaic_0001>
module attributes {stable_mosaic.version = 11 : i64} {
  func.func @qfunction_kernel(%arg0: i32, %arg1: memref<128x32xf32, #tpu.memory_space<vmem>>, %arg2: memref<32x128xf32, #tpu.memory_space<vmem>>, %arg3: memref<1x128xf32, #tpu.memory_space<vmem>>, %arg4: memref<128x128xf32, #tpu.memory_space<vmem>>, %arg5: memref<1x128xf32, #tpu.memory_space<vmem>>, %arg6: memref<128x8xf32, #tpu.memory_space<vmem>>, %arg7: memref<1x8xf32, #tpu.memory_space<vmem>>, %arg8: memref<128x8xf32, #tpu.memory_space<vmem>>) attributes {dimension_semantics = [#tpu.dimension_semantics<parallel>], iteration_bounds = array<i64: 2>, scalar_prefetch = 0 : i64, scratch_operands = 0 : i64, tpu.core_type = #tpu.core_type<tc>, window_params = [{transform_indices = @transform_0, window_bounds = array<i64: 128, 32>}, {pipeline_mode = #tpu.pipeline_mode<synchronous>, transform_indices = @transform_1, window_bounds = array<i64: 32, 128>}, {pipeline_mode = #tpu.pipeline_mode<synchronous>, transform_indices = @transform_2, window_bounds = array<i64: 1, 128>}, {pipeline_mode = #tpu.pipeline_mode<synchronous>, transform_indices = @transform_3, window_bounds = array<i64: 128, 128>}, {pipeline_mode = #tpu.pipeline_mode<synchronous>, transform_indices = @transform_4, window_bounds = array<i64: 1, 128>}, {pipeline_mode = #tpu.pipeline_mode<synchronous>, transform_indices = @transform_5, window_bounds = array<i64: 128, 8>}, {pipeline_mode = #tpu.pipeline_mode<synchronous>, transform_indices = @transform_6, window_bounds = array<i64: 1, 8>}, {transform_indices = @transform_7, window_bounds = array<i64: 128, 8>}]} {
    %c0 = arith.constant 0 : index
    %c0_0 = arith.constant 0 : index
    %0 = vector.load %arg1[%c0, %c0_0] : memref<128x32xf32, #tpu.memory_space<vmem>>, vector<128x32xf32>
    %c0_1 = arith.constant 0 : index
    %c0_2 = arith.constant 0 : index
    %1 = vector.load %arg2[%c0_1, %c0_2] : memref<32x128xf32, #tpu.memory_space<vmem>>, vector<32x128xf32>
    %cst = arith.constant dense<0.000000e+00> : vector<128x128xf32>
    %2 = tpu.matmul %0, %1, %cst {dimension_numbers = #tpu.dot_dimension_numbers<[1], [0], [0], [1], [0, 0, 1, 1], [], []>} : vector<128x32xf32>, vector<32x128xf32>, vector<128x128xf32> -> vector<128x128xf32>
    %c0_3 = arith.constant 0 : index
    %c0_4 = arith.constant 0 : index
    %3 = vector.load %arg3[%c0_3, %c0_4] : memref<1x128xf32, #tpu.memory_space<vmem>>, vector<1x128xf32>
    %4 = vector.broadcast %3 : vector<1x128xf32> to vector<128x128xf32>
    %5 = arith.addf %2, %4 : vector<128x128xf32>
    %cst_5 = arith.constant 0.000000e+00 : f32
    %6 = vector.broadcast %cst_5 : f32 to vector<128x128xf32>
    %7 = arith.maximumf %5, %6 : vector<128x128xf32>
    %c0_6 = arith.constant 0 : index
    %c0_7 = arith.constant 0 : index
    %8 = vector.load %arg4[%c0_6, %c0_7] : memref<128x128xf32, #tpu.memory_space<vmem>>, vector<128x128xf32>
    %cst_8 = arith.constant dense<0.000000e+00> : vector<128x128xf32>
    %9 = tpu.matmul %7, %8, %cst_8 {dimension_numbers = #tpu.dot_dimension_numbers<[1], [0], [0], [1], [0, 0, 1, 1], [], []>} : vector<128x128xf32>, vector<128x128xf32>, vector<128x128xf32> -> vector<128x128xf32>
    %c0_9 = arith.constant 0 : index
    %c0_10 = arith.constant 0 : index
    %10 = vector.load %arg5[%c0_9, %c0_10] : memref<1x128xf32, #tpu.memory_space<vmem>>, vector<1x128xf32>
    %11 = vector.broadcast %10 : vector<1x128xf32> to vector<128x128xf32>
    %12 = arith.addf %9, %11 : vector<128x128xf32>
    %cst_11 = arith.constant 0.000000e+00 : f32
    %13 = vector.broadcast %cst_11 : f32 to vector<128x128xf32>
    %14 = arith.maximumf %12, %13 : vector<128x128xf32>
    %c0_12 = arith.constant 0 : index
    %c0_13 = arith.constant 0 : index
    %15 = vector.load %arg6[%c0_12, %c0_13] : memref<128x8xf32, #tpu.memory_space<vmem>>, vector<128x8xf32>
    %cst_14 = arith.constant dense<0.000000e+00> : vector<128x8xf32>
    %16 = tpu.matmul %14, %15, %cst_14 {dimension_numbers = #tpu.dot_dimension_numbers<[1], [0], [0], [1], [0, 0, 1, 1], [], []>} : vector<128x128xf32>, vector<128x8xf32>, vector<128x8xf32> -> vector<128x8xf32>
    %c0_15 = arith.constant 0 : index
    %c0_16 = arith.constant 0 : index
    %17 = vector.load %arg7[%c0_15, %c0_16] : memref<1x8xf32, #tpu.memory_space<vmem>>, vector<1x8xf32>
    %18 = vector.broadcast %17 : vector<1x8xf32> to vector<128x8xf32>
    %19 = arith.addf %16, %18 : vector<128x8xf32>
    %c0_17 = arith.constant 0 : index
    %c0_18 = arith.constant 0 : index
    %20 = vector.load %arg8[%c0_17, %c0_18] : memref<128x8xf32, #tpu.memory_space<vmem>>, vector<128x8xf32>
    tpu.vector_store %arg8[%c0_17, %c0_18], %19 {strides = array<i32>} : memref<128x8xf32, #tpu.memory_space<vmem>>, vector<128x8xf32>,
    return
  }
  func.func @transform_0(%arg0: i32) -> (i32, i32) {
    %c0_i32 = arith.constant 0 : i32
    %c0_i32_0 = arith.constant 0 : i32
    return %arg0, %c0_i32 : i32, i32
  }
  func.func @transform_1(%arg0: i32) -> (i32, i32) {
    %c0_i32 = arith.constant 0 : i32
    %c0_i32_0 = arith.constant 0 : i32
    %c0_i32_1 = arith.constant 0 : i32
    return %c0_i32, %c0_i32_0 : i32, i32
  }
  func.func @transform_2(%arg0: i32) -> (i32, i32) {
    %c0_i32 = arith.constant 0 : i32
    %c0_i32_0 = arith.constant 0 : i32
    %c0_i32_1 = arith.constant 0 : i32
    return %c0_i32, %c0_i32_0 : i32, i32
  }
  func.func @transform_3(%arg0: i32) -> (i32, i32) {
    %c0_i32 = arith.constant 0 : i32
    %c0_i32_0 = arith.constant 0 : i32
    %c0_i32_1 = arith.constant 0 : i32
    return %c0_i32, %c0_i32_0 : i32, i32
  }
  func.func @transform_4(%arg0: i32) -> (i32, i32) {
    %c0_i32 = arith.constant 0 : i32
    %c0_i32_0 = arith.constant 0 : i32
    %c0_i32_1 = arith.constant 0 : i32
    return %c0_i32, %c0_i32_0 : i32, i32
  }
  func.func @transform_5(%arg0: i32) -> (i32, i32) {
    %c0_i32 = arith.constant 0 : i32
    %c0_i32_0 = arith.constant 0 : i32
    %c0_i32_1 = arith.constant 0 : i32
    return %c0_i32, %c0_i32_0 : i32, i32
  }
  func.func @transform_6(%arg0: i32) -> (i32, i32) {
    %c0_i32 = arith.constant 0 : i32
    %c0_i32_0 = arith.constant 0 : i32
    %c0_i32_1 = arith.constant 0 : i32
    return %c0_i32, %c0_i32_0 : i32, i32
  }
  func.func @transform_7(%arg0: i32) -> (i32, i32) {
    %c0_i32 = arith.constant 0 : i32
    %c0_i32_0 = arith.constant 0 : i32
    return %arg0, %c0_i32 : i32, i32
  }
}

</mosaic_0001>

<bundles_post_ra>
// kernel: tpu_custom_call.1
= control target key start
LH: loop header
LB: loop body
LE: loop exit
PB: predicated region body
PF: predicated region fallthrough
CT: control target
= control target key end

     0   :  { %s813_s24 = smov 0   ;;  %s1040_s0 = inlined_call_operand.vmem [shape: f32[256,32], index: 0, kind: input, shape index: {}]   ;;  %s1041_s1 = inlined_call_operand.vmem [shape: f32[32,128], index: 1, kind: input, shape index: {}]   ;;  %s1042_s2 = inlined_call_operand.vmem [shape: f32[1,128], index: 2, kind: input, shape index: {}]   ;;  %s1043_s3 = inlined_call_operand.vmem [shape: f32[128,128], index: 3, kind: input, shape index: {}]   ;;  %s1044_s4 = inlined_call_operand.vmem [shape: f32[1,128], index: 4, kind: input, shape index: {}]   ;;  %s1045_s5 = inlined_call_operand.vmem [shape: f32[128,8], index: 5, kind: input, shape index: {}]   ;;  %s1046_s6 = inlined_call_operand.vmem [shape: f32[1,8], index: 6, kind: input, shape index: {}]   ;;  %s1047_s7 = inlined_call_operand.vmem [shape: f32[256,8], index: 7, kind: output, shape index: {}]  }
   0x1 LB: > { %s695_s25 = sadd.s32 4294967295, %s771_s24   ;;  %p699_p0 = scmp.ge.s32.totalorder %s771_s24, 1  ;;  %s771_s24 = sphi %s813_s24, %s17_s24  }
   0x2   : > { %p238_p1 = scmp.lt.s32.totalorder %s771_s24, 3 }
   0x4   : > { %p239_p2 = pnand %p699_p0, %p238_p1 }
   0x5   : > { %s700_s30 = sshll.u32 (!%p239_p2), %s695_s25, 4 }
   0x6   : > { %242 = sbr.rel (%p239_p2) target bundleno = 540 (0x21c), region = 48  ;;  %p271_p3 = scmp.lt.s32.totalorder (!%p239_p2), %s700_s30, 31 }
   0xb   : > { %v301_v0 = vld [vmem:[%s1041_s1 + $0x18] sm:$0xff]  ;;  %v300_v1 = vld [vmem:[%s1041_s1 + $0x10] sm:$0xff]  ;;  %v299_v2 = vld [vmem:[%s1041_s1 + $0x8] sm:$0xff]  ;;  %s1049_s30 = smov (!%p271_p3, %s700_s30), 31  ;;  %vm306_vm0 = vcmask 261120   ;;  %vm622_vm1 = vcmask 64512  }
   0xc   : > { %367 = vmatpush.msra.mxu0 %v301_v0  ;;  %v298_v3 = vld [vmem:[%s1041_s1] sm:$0xff]  ;;  %s701_s12 = sshll.u32 %s1049_s30, 3  ;;  %v451_v13 = vld [vmem:[%s1043_s3 + $0x78] sm:$0xff]  ;;  %v450_v14 = vld [vmem:[%s1043_s3 + $0x70] sm:$0xff] }
   0xd   : > { %s841_s15 = scalar_lea.vmem %s1040_s0, %s701_s12  ;;  %456 = vmatpush.msra.mxu1 %v451_v13  ;;  %722 = vmatpush.msra.mxu3 %v451_v13  ;;  %v449_v15 = vld [vmem:[%s1043_s3 + $0x68] sm:$0xff]  ;;  %v448_v17 = vld [vmem:[%s1043_s3 + $0x60] sm:$0xff]  ;;  %v447_v18 = vld [vmem:[%s1043_s3 + $0x58] sm:$0xff]  ;;  %s1003_s8 = scalar_lea.vmem %s1047_s7, %s701_s12 }
   0xe   : > { %368 = vmatpush.msra.mxu0 %v300_v1  ;;  %v282_v4 = vld [vmem:[%s841_s15] sm:$0xff]  ;;  %v283_v5 = vld [vmem:[%s841_s15 + $0x8] sm:$0xff]  ;;  %v284_v6 = vld [vmem:[%s841_s15 + $0x10] sm:$0xff] }
   0xf   : > { %v285_v7 = vld [vmem:[%s841_s15 + $0x18] sm:$0xff]  ;;  %v286_v8 = vld [vmem:[%s841_s15 + $0x20] sm:$0xff]  ;;  %v287_v9 = vld [vmem:[%s841_s15 + $0x28] sm:$0xff]  ;;  %457 = vmatpush.msra.mxu1 %v450_v14  ;;  %723 = vmatpush.msra.mxu3 %v450_v14 }
  0x10   : > { %369 = vmatpush.msra.mxu0 %v299_v2  ;;  %v288_v10 = vld [vmem:[%s841_s15 + $0x30] sm:$0xff]  ;;  %v289_v11 = vld [vmem:[%s841_s15 + $0x38] sm:$0xff]  ;;  %v290_v12 = vld [vmem:[%s841_s15 + $0x40] sm:$0xff] }
  0x11   : > { %v291_v16 = vld [vmem:[%s841_s15 + $0x48] sm:$0xff]  ;;  %458 = vmatpush.msra.mxu1 %v449_v15  ;;  %724 = vmatpush.msra.mxu3 %v449_v15  ;;  %v446_v19 = vld [vmem:[%s1043_s3 + $0x50] sm:$0xff]  ;;  %v444_v22 = vld [vmem:[%s1043_s3 + $0x40] sm:$0xff] }
  0x12   : > { %370 = vmatpush.msra.mxu0 %v298_v3  ;;  %v445_v20 = vld [vmem:[%s1043_s3 + $0x48] sm:$0xff]  ;;  %v292_v21 = vld [vmem:[%s841_s15 + $0x50] sm:$0xff]  ;;  %v443_v23 = vld [vmem:[%s1043_s3 + $0x38] sm:$0xff] }
  0x13   : > { %704 = vmatmul.msk.f32.vlgmr.msra.gmra.mxu0 %vm306_vm0, %v282_v4  ;;  %459 = vmatpush.msra.mxu1 %v448_v17  ;;  %v442_v24 = vld [vmem:[%s1043_s3 + $0x30] sm:$0xff]  ;;  %v441_v25 = vld [vmem:[%s1043_s3 + $0x28] sm:$0xff]  ;;  %v293_v26 = vld [vmem:[%s841_s15 + $0x58] sm:$0xff] }
  0x14   : > { %725 = vmatpush.msra.mxu3 %v448_v17  ;;  %v440_v27 = vld [vmem:[%s1043_s3 + $0x20] sm:$0xff]  ;;  %v439_v28 = vld [vmem:[%s1043_s3 + $0x18] sm:$0xff]  ;;  %v438_v29 = vld [vmem:[%s1043_s3 + $0x10] sm:$0xff] }
  0x15   : > { %460 = vmatpush.msra.mxu1 %v447_v18  ;;  %v294_v30 = vld [vmem:[%s841_s15 + $0x60] sm:$0xff]  ;;  %v437_v31 = vld [vmem:[%s1043_s3 + $0x8] sm:$0xff]  ;;  %v296_v34 = vld [vmem:[%s841_s15 + $0x70] sm:$0xff] }
  0x16   : > { %726 = vmatpush.msra.mxu3 %v447_v18  ;;  %v436_v32 = vld [vmem:[%s1043_s3] sm:$0xff]  ;;  %v295_v33 = vld [vmem:[%s841_s15 + $0x68] sm:$0xff]  ;;  %v297_v35 = vld [vmem:[%s841_s15 + $0x78] sm:$0xff] }
  0x17   : > { %461 = vmatpush.msra.mxu1 %v446_v19  ;;  %v926_v36 = vld [vmem:[%s1042_s2] ss:$0 sm:$0xff]  ;;  %v552_v0 = vld [vmem:[%s1045_s5 + $0x78] sm:$0xff]  ;;  %v551_v3 = vld [vmem:[%s1045_s5 + $0x70] sm:$0xff] }
  0x18   : > { %727 = vmatpush.msra.mxu3 %v446_v19  ;;  %557 = vmatpush.msra.mxu2 %v552_v0  ;;  %v545_v13 = vld [vmem:[%s1045_s5 + $0x40] sm:$0xff]  ;;  %v544_v14 = vld [vmem:[%s1045_s5 + $0x38] sm:$0xff]  ;;  %v543_v17 = vld [vmem:[%s1045_s5 + $0x30] sm:$0xff] }
  0x19   : > { %462 = vmatpush.msra.mxu1 %v445_v20  ;;  %v542_v19 = vld [vmem:[%s1045_s5 + $0x28] sm:$0xff] }
  0x1a   : > { %728 = vmatpush.msra.mxu3 %v445_v20  ;;  %558 = vmatpush.msra.mxu2 %v551_v3  ;;  %v541_v20 = vld [vmem:[%s1045_s5 + $0x20] sm:$0xff] }
  0x1b   : > { %705 = vmatmul.msk.f32.gmra.mxu0 %vm306_vm0, %v283_v5  ;;  %463 = vmatpush.msra.mxu1 %v444_v22  ;;  %v550_v5 = vld [vmem:[%s1045_s5 + $0x68] sm:$0xff] }
  0x1c   : > { %729 = vmatpush.msra.mxu3 %v444_v22  ;;  %559 = vmatpush.msra.mxu2 %v550_v5 }
  0x1d   : > { %464 = vmatpush.msra.mxu1 %v443_v23 }
  0x1e   : > { %730 = vmatpush.msra.mxu3 %v443_v23 }
  0x1f   : > { %465 = vmatpush.msra.mxu1 %v442_v24 }
  0x20   : > { %731 = vmatpush.msra.mxu3 %v442_v24  ;;  %v539_v24 = vld [vmem:[%s1045_s5 + $0x10] sm:$0xff] }
  0x21   : > { %466 = vmatpush.msra.mxu1 %v441_v25 }
  0x22   : > { %732 = vmatpush.msra.mxu3 %v441_v25 }
  0x23   : > { %706 = vmatmul.msk.f32.gmra.mxu0 %vm306_vm0, %v284_v6  ;;  %467 = vmatpush.msra.mxu1 %v440_v27  ;;  %v549_v6 = vld [vmem:[%s1045_s5 + $0x60] sm:$0xff] }
  0x24   : > { %733 = vmatpush.msra.mxu3 %v440_v27  ;;  %560 = vmatpush.msra.mxu2 %v549_v6  ;;  %v537_v27 = vld [vmem:[%s1045_s5] sm:$0xff] }
  0x25   : > { %468 = vmatpush.msra.mxu1 %v439_v28 }
  0x26   : > { %734 = vmatpush.msra.mxu3 %v439_v28 }
  0x27   : > { %469 = vmatpush.msra.mxu1 %v438_v29 }
  0x28   : > { %735 = vmatpush.msra.mxu3 %v438_v29 }
  0x29   : > { %470 = vmatpush.msra.mxu1 %v437_v31 }
  0x2a   : > { %736 = vmatpush.msra.mxu3 %v437_v31 }
  0x2b   : > { %707 = vmatmul.msk.f32.gmra.mxu0 %vm306_vm0, %v285_v7  ;;  %471 = vmatpush.msra.mxu1 %v436_v32  ;;  %v548_v7 = vld [vmem:[%s1045_s5 + $0x58] sm:$0xff] }
  0x2c   : > { %737 = vmatpush.msra.mxu3 %v436_v32  ;;  %561 = vmatpush.msra.mxu2 %v548_v7 }
  0x2e   : > { %738 = vmatpush.msrb.mxu3 %v552_v0 }
  0x30   : > { %739 = vmatpush.msrb.mxu3 %v551_v3 }
  0x32   : > { %740 = vmatpush.msrb.mxu3 %v550_v5 }
  0x33   : > { %708 = vmatmul.msk.f32.gmra.mxu0 %vm306_vm0, %v286_v8 }
  0x34   : > { %741 = vmatpush.msrb.mxu3 %v549_v6 }
  0x36   : > { %742 = vmatpush.msrb.mxu3 %v548_v7 }
  0x3b   : > { %709 = vmatmul.msk.f32.gmra.mxu0 %vm306_vm0, %v287_v9 }
  0x43   : > { %710 = vmatmul.msk.f32.gmra.mxu0 %vm306_vm0, %v288_v10  ;;  %v547_v10 = vld [vmem:[%s1045_s5 + $0x50] sm:$0xff] }
  0x44   : > { %562 = vmatpush.msra.mxu2 %v547_v10  ;;  %743 = vmatpush.msrb.mxu3 %v547_v10 }
  0x4b   : > { %711 = vmatmul.msk.f32.gmra.mxu0 %vm306_vm0, %v289_v11 }
  0x53   : > { %712 = vmatmul.msk.f32.gmra.mxu0 %vm306_vm0, %v290_v12  ;;  %v546_v12 = vld [vmem:[%s1045_s5 + $0x48] sm:$0xff] }
  0x54   : > { %563 = vmatpush.msra.mxu2 %v546_v12  ;;  %744 = vmatpush.msrb.mxu3 %v546_v12 }
  0x56   : > { %564 = vmatpush.msra.mxu2 %v545_v13  ;;  %745 = vmatpush.msrb.mxu3 %v545_v13 }
  0x58   : > { %565 = vmatpush.msra.mxu2 %v544_v14  ;;  %746 = vmatpush.msrb.mxu3 %v544_v14 }
  0x5a   : > { %566 = vmatpush.msra.mxu2 %v543_v17  ;;  %747 = vmatpush.msrb.mxu3 %v543_v17 }
  0x5b   : > { %713 = vmatmul.msk.f32.gmra.mxu0 %vm306_vm0, %v291_v16 }
  0x5c   : > { %567 = vmatpush.msra.mxu2 %v542_v19  ;;  %748 = vmatpush.msrb.mxu3 %v542_v19 }
  0x5e   : > { %568 = vmatpush.msra.mxu2 %v541_v20  ;;  %749 = vmatpush.msrb.mxu3 %v541_v20 }
  0x63   : > { %714 = vmatmul.msk.f32.gmra.mxu0 %vm306_vm0, %v292_v21  ;;  %v540_v21 = vld [vmem:[%s1045_s5 + $0x18] sm:$0xff] }
  0x64   : > { %569 = vmatpush.msra.mxu2 %v540_v21  ;;  %750 = vmatpush.msrb.mxu3 %v540_v21 }
  0x66   : > { %570 = vmatpush.msra.mxu2 %v539_v24  ;;  %751 = vmatpush.msrb.mxu3 %v539_v24 }
  0x6b   : > { %715 = vmatmul.msk.f32.gmra.mxu0 %vm306_vm0, %v293_v26  ;;  %v538_v26 = vld [vmem:[%s1045_s5 + $0x8] sm:$0xff] }
  0x6c   : > { %571 = vmatpush.msra.mxu2 %v538_v26  ;;  %752 = vmatpush.msrb.mxu3 %v538_v26 }
  0x6e   : > { %572 = vmatpush.msra.mxu2 %v537_v27  ;;  %753 = vmatpush.msrb.mxu3 %v537_v27 }
  0x73   : > { %716 = vmatmul.msk.f32.gmra.mxu0 %vm306_vm0, %v294_v30 }
  0x7b   : > { %717 = vmatmul.msk.f32.gmra.mxu0 %vm306_vm0, %v295_v33 }
  0x83   : > { %718 = vmatmul.msk.f32.gmra.mxu0 %vm306_vm0, %v296_v34 }
  0x8b   : > { %719 = vmatmul.msk.f32.gmra.mxu0 %vm306_vm0, %v297_v35 }
  0x90   : > { %v372_v37 = vpop.f32.mrf.mxu0 }
  0x91   : > { %v373_v38 = vadd.f32 %v926_v36, %v372_v37 }
  0x93   : > { %v420_v39 = vmax.f32 %v373_v38, 0.0  ;;  %v763_v38 = vld [vmem:[%s1044_s4] ss:$0 sm:$0xff] }
  0x95   : > { %472 = vmatmul.f32.vlgmr.msra.gmra.mxu1 %v420_v39 }
  0x98   : > { %v375_v40 = vpop.f32.mrf.mxu0 }
  0x99   : > { %v376_v41 = vadd.f32 %v926_v36, %v375_v40 }
  0x9b   : > { %v421_v42 = vmax.f32 %v376_v41, 0.0 }
  0x9d   : > { %475 = vmatmul.f32.gmra.mxu1 %v421_v42 }
  0xa0   : > { %v378_v43 = vpop.f32.mrf.mxu0 }
  0xa1   : > { %v379_v44 = vadd.f32 %v926_v36, %v378_v43 }
  0xa3   : > { %v422_v45 = vmax.f32 %v379_v44, 0.0 }
  0xa5   : > { %478 = vmatmul.f32.gmra.mxu1 %v422_v45 }
  0xa8   : > { %v381_v46 = vpop.f32.mrf.mxu0 }
  0xa9   : > { %v382_v47 = vadd.f32 %v926_v36, %v381_v46 }
  0xab   : > { %v423_v48 = vmax.f32 %v382_v47, 0.0 }
  0xad   : > { %481 = vmatmul.f32.gmra.mxu1 %v423_v48 }
  0xb0   : > { %v384_v49 = vpop.f32.mrf.mxu0 }
  0xb1   : > { %v385_v50 = vadd.f32 %v926_v36, %v384_v49 }
  0xb3   : > { %v424_v51 = vmax.f32 %v385_v50, 0.0 }
  0xb5   : > { %484 = vmatmul.f32.gmra.mxu1 %v424_v51 }
  0xb8   : > { %v387_v52 = vpop.f32.mrf.mxu0 }
  0xb9   : > { %v388_v53 = vadd.f32 %v926_v36, %v387_v52 }
  0xbb   : > { %v425_v54 = vmax.f32 %v388_v53, 0.0 }
  0xbd   : > { %487 = vmatmul.f32.gmra.mxu1 %v425_v54 }
  0xc0   : > { %v390_v55 = vpop.f32.mrf.mxu0 }
  0xc1   : > { %v391_v56 = vadd.f32 %v926_v36, %v390_v55 }
  0xc3   : > { %v426_v57 = vmax.f32 %v391_v56, 0.0 }
  0xc5   : > { %490 = vmatmul.f32.gmra.mxu1 %v426_v57 }
  0xc8   : > { %v393_v58 = vpop.f32.mrf.mxu0 }
  0xc9   : > { %v394_v59 = vadd.f32 %v926_v36, %v393_v58 }
  0xcb   : > { %v427_v60 = vmax.f32 %v394_v59, 0.0 }
  0xcd   : > { %493 = vmatmul.f32.gmra.mxu1 %v427_v60 }
  0xd0   : > { %v396_v61 = vpop.f32.mrf.mxu0 }
  0xd1   : > { %v397_v62 = vadd.f32 %v926_v36, %v396_v61 }
  0xd3   : > { %v428_v63 = vmax.f32 %v397_v62, 0.0 }
  0xd5   : > { %496 = vmatmul.f32.gmra.mxu1 %v428_v63 }
  0xd8   : > { %v399_v1 = vpop.f32.mrf.mxu0 }
  0xd9   : > { %v400_v2 = vadd.f32 %v926_v36, %v399_v1 }
  0xdb   : > { %v429_v4 = vmax.f32 %v400_v2, 0.0 }
  0xdd   : > { %499 = vmatmul.f32.gmra.mxu1 %v429_v4 }
  0xe0   : > { %v402_v8 = vpop.f32.mrf.mxu0 }
  0xe1   : > { %v403_v9 = vadd.f32 %v926_v36, %v402_v8 }
  0xe3   : > { %v430_v11 = vmax.f32 %v403_v9, 0.0 }
  0xe5   : > { %502 = vmatmul.f32.gmra.mxu1 %v430_v11 }
  0xe8   : > { %v405_v15 = vpop.f32.mrf.mxu0 }
  0xe9   : > { %v406_v16 = vadd.f32 %v926_v36, %v405_v15 }
  0xeb   : > { %v431_v18 = vmax.f32 %v406_v16, 0.0 }
  0xed   : > { %505 = vmatmul.f32.gmra.mxu1 %v431_v18 }
  0xf0   : > { %v408_v22 = vpop.f32.mrf.mxu0 }
  0xf1   : > { %v409_v23 = vadd.f32 %v926_v36, %v408_v22  ;;  %v764_v22 = vld [vmem:[%s1046_s6] ss:$0 sm:$0xff] }
  0xf3   : > { %v432_v25 = vmax.f32 %v409_v23, 0.0 }
  0xf5   : > { %508 = vmatmul.f32.vlgmr.msra.gmra.mxu3 %v432_v25 }
  0xf8   : > { %v411_v28 = vpop.f32.mrf.mxu0 }
  0xf9   : > { %v412_v29 = vadd.f32 %v926_v36, %v411_v28 }
  0xfb   : > { %v433_v30 = vmax.f32 %v412_v29, 0.0 }
  0xfd   : > { %511 = vmatmul.f32.gmra.mxu3 %v433_v30 }
 0x100   : > { %v414_v31 = vpop.f32.mrf.mxu0 }
 0x101   : > { %v415_v32 = vadd.f32 %v926_v36, %v414_v31 }
 0x103   : > { %v434_v33 = vmax.f32 %v415_v32, 0.0 }
 0x105   : > { %514 = vmatmul.f32.gmra.mxu3 %v434_v33 }
 0x108   : > { %v417_v34 = vpop.f32.mrf.mxu0 }
 0x109   : > { %v418_v35 = vadd.f32 %v926_v36, %v417_v34 }
 0x10b   : > { %v435_v37 = vmax.f32 %v418_v35, 0.0 }
 0x10d   : > { %517 = vmatmul.f32.gmra.mxu3 %v435_v37 }
 0x112   : > { %v473_v39 = vpop.f32.mrf.mxu1 }
 0x113   : > { %v474_v40 = vadd.f32 %v763_v38, %v473_v39 }
 0x115   : > { %v521_v41 = vmax.f32 %v474_v40, 0.0 }
 0x117   : > { %573 = vmatmul.f32.vlgmr.msra.gmra.mxu2 %v521_v41 }
 0x11a   : > { %v476_v42 = vpop.f32.mrf.mxu1 }
 0x11b   : > { %v477_v43 = vadd.f32 %v763_v38, %v476_v42 }
 0x11d   : > { %v522_v44 = vmax.f32 %v477_v43, 0.0 }
 0x11f   : > { %576 = vmatmul.f32.gmra.mxu2 %v522_v44 }
 0x122   : > { %v479_v45 = vpop.f32.mrf.mxu1 }
 0x123   : > { %v480_v46 = vadd.f32 %v763_v38, %v479_v45 }
 0x125   : > { %v523_v47 = vmax.f32 %v480_v46, 0.0 }
 0x127   : > { %579 = vmatmul.f32.gmra.mxu2 %v523_v47 }
 0x12a   : > { %v482_v48 = vpop.f32.mrf.mxu1 }
 0x12b   : > { %v483_v36 = vadd.f32 %v763_v38, %v482_v48 }
 0x12d   : > { %v524_v49 = vmax.f32 %v483_v36, 0.0 }
 0x12f   : > { %582 = vmatmul.f32.gmra.mxu2 %v524_v49 }
 0x132   : > { %v485_v50 = vpop.f32.mrf.mxu1 }
 0x133   : > { %v486_v51 = vadd.f32 %v763_v38, %v485_v50 }
 0x135   : > { %v525_v52 = vmax.f32 %v486_v51, 0.0 }
 0x137   : > { %585 = vmatmul.f32.gmra.mxu2 %v525_v52 }
 0x13a   : > { %v488_v53 = vpop.f32.mrf.mxu1 }
 0x13b   : > { %v489_v54 = vadd.f32 %v763_v38, %v488_v53 }
 0x13d   : > { %v526_v55 = vmax.f32 %v489_v54, 0.0 }
 0x13f   : > { %588 = vmatmul.f32.gmra.mxu2 %v526_v55 }
 0x142   : > { %v491_v56 = vpop.f32.mrf.mxu1 }
 0x143   : > { %v492_v57 = vadd.f32 %v763_v38, %v491_v56 }
 0x145   : > { %v527_v58 = vmax.f32 %v492_v57, 0.0 }
 0x147   : > { %591 = vmatmul.f32.gmra.mxu2 %v527_v58 }
 0x14a   : > { %v494_v59 = vpop.f32.mrf.mxu1 }
 0x14b   : > { %v495_v60 = vadd.f32 %v763_v38, %v494_v59 }
 0x14d   : > { %v528_v61 = vmax.f32 %v495_v60, 0.0 }
 0x14f   : > { %594 = vmatmul.f32.gmra.mxu2 %v528_v61 }
 0x152   : > { %v497_v62 = vpop.f32.mrf.mxu1 }
 0x153   : > { %v498_v63 = vadd.f32 %v763_v38, %v497_v62 }
 0x155   : > { %v529_v0 = vmax.f32 %v498_v63, 0.0 }
 0x157   : > { %597 = vmatmul.f32.gmra.mxu2 %v529_v0 }
 0x15a   : > { %v500_v1 = vpop.f32.mrf.mxu1 }
 0x15b   : > { %v501_v2 = vadd.f32 %v763_v38, %v500_v1 }
 0x15d   : > { %v530_v3 = vmax.f32 %v501_v2, 0.0 }
 0x15f   : > { %600 = vmatmul.f32.gmra.mxu2 %v530_v3 }
 0x162   : > { %v503_v4 = vpop.f32.mrf.mxu1 }
 0x163   : > { %v504_v5 = vadd.f32 %v763_v38, %v503_v4 }
 0x165   : > { %v531_v6 = vmax.f32 %v504_v5, 0.0 }
 0x167   : > { %603 = vmatmul.f32.gmra.mxu2 %v531_v6 }
 0x16a   : > { %v506_v7 = vpop.f32.mrf.mxu1 }
 0x16b   : > { %v507_v8 = vadd.f32 %v763_v38, %v506_v7 }
 0x16d   : > { %v532_v9 = vmax.f32 %v507_v8, 0.0 }
 0x16f   : > { %606 = vmatmul.f32.gmra.mxu2 %v532_v9 }
 0x178   : > { %v509_v10 = vpop.f32.mrf.mxu3 }
 0x179   : > { %v510_v11 = vadd.f32 %v763_v38, %v509_v10 }
 0x17b   : > { %v533_v12 = vmax.f32 %v510_v11, 0.0 }
 0x17d   : > { %609 = vmatmul.f32.vlgmr.msrb.gmra.mxu3 %v533_v12 }
 0x180   : > { %v512_v13 = vpop.f32.mrf.mxu3 }
 0x181   : > { %v513_v14 = vadd.f32 %v763_v38, %v512_v13 }
 0x183   : > { %v534_v15 = vmax.f32 %v513_v14, 0.0 }
 0x185   : > { %612 = vmatmul.f32.gmra.mxu3 %v534_v15 }
 0x188   : > { %v515_v16 = vpop.f32.mrf.mxu3 }
 0x189   : > { %v516_v17 = vadd.f32 %v763_v38, %v515_v16 }
 0x18b   : > { %v535_v18 = vmax.f32 %v516_v17, 0.0 }
 0x18d   : > { %615 = vmatmul.f32.gmra.mxu3 %v535_v18 }
 0x190   : > { %v518_v19 = vpop.f32.mrf.mxu3 }
 0x191   : > { %v519_v20 = vadd.f32 %v763_v38, %v518_v19 }
 0x193   : > { %v536_v21 = vmax.f32 %v519_v20, 0.0 }
 0x195   : > { %618 = vmatmul.f32.gmra.mxu3 %v536_v21 }
 0x19a   : > { %v574_v23 = vpop.f32.mrf.mxu2 }
 0x19b   : > { %v575_v24 = vadd.f32 %v764_v22, %v574_v23 }
 0x19d   : > { %623 = vst.msk [vmem:[%s1003_s8] sm:$0xff] %vm622_vm1, %v575_v24 }
 0x1a2   : > { %v577_v25 = vpop.f32.mrf.mxu2 }
 0x1a3   : > { %v578_v26 = vadd.f32 %v764_v22, %v577_v25 }
 0x1a5   : > { %624 = vst.msk [vmem:[%s1003_s8 + $0x8] sm:$0xff] %vm622_vm1, %v578_v26 }
 0x1aa   : > { %v580_v27 = vpop.f32.mrf.mxu2 }
 0x1ab   : > { %v581_v28 = vadd.f32 %v764_v22, %v580_v27 }
 0x1ad   : > { %625 = vst.msk [vmem:[%s1003_s8 + $0x10] sm:$0xff] %vm622_vm1, %v581_v28 }
 0x1b2   : > { %v583_v29 = vpop.f32.mrf.mxu2 }
 0x1b3   : > { %v584_v30 = vadd.f32 %v764_v22, %v583_v29 }
 0x1b5   : > { %626 = vst.msk [vmem:[%s1003_s8 + $0x18] sm:$0xff] %vm622_vm1, %v584_v30 }
 0x1ba   : > { %v586_v31 = vpop.f32.mrf.mxu2 }
 0x1bb   : > { %v587_v32 = vadd.f32 %v764_v22, %v586_v31 }
 0x1bd   : > { %627 = vst.msk [vmem:[%s1003_s8 + $0x20] sm:$0xff] %vm622_vm1, %v587_v32 }
 0x1c2   : > { %v589_v33 = vpop.f32.mrf.mxu2 }
 0x1c3   : > { %v590_v34 = vadd.f32 %v764_v22, %v589_v33 }
 0x1c5   : > { %628 = vst.msk [vmem:[%s1003_s8 + $0x28] sm:$0xff] %vm622_vm1, %v590_v34 }
 0x1ca   : > { %v592_v35 = vpop.f32.mrf.mxu2 }
 0x1cb   : > { %v593_v37 = vadd.f32 %v764_v22, %v592_v35 }
 0x1cd   : > { %629 = vst.msk [vmem:[%s1003_s8 + $0x30] sm:$0xff] %vm622_vm1, %v593_v37 }
 0x1d2   : > { %v595_v38 = vpop.f32.mrf.mxu2 }
 0x1d3   : > { %v596_v39 = vadd.f32 %v764_v22, %v595_v38 }
 0x1d5   : > { %630 = vst.msk [vmem:[%s1003_s8 + $0x38] sm:$0xff] %vm622_vm1, %v596_v39 }
 0x1da   : > { %v598_v40 = vpop.f32.mrf.mxu2 }
 0x1db   : > { %v599_v41 = vadd.f32 %v764_v22, %v598_v40 }
 0x1dd   : > { %631 = vst.msk [vmem:[%s1003_s8 + $0x40] sm:$0xff] %vm622_vm1, %v599_v41 }
 0x1e2   : > { %v601_v42 = vpop.f32.mrf.mxu2 }
 0x1e3   : > { %v602_v43 = vadd.f32 %v764_v22, %v601_v42 }
 0x1e5   : > { %632 = vst.msk [vmem:[%s1003_s8 + $0x48] sm:$0xff] %vm622_vm1, %v602_v43 }
 0x1ea   : > { %v604_v44 = vpop.f32.mrf.mxu2 }
 0x1eb   : > { %v605_v45 = vadd.f32 %v764_v22, %v604_v44 }
 0x1ed   : > { %633 = vst.msk [vmem:[%s1003_s8 + $0x50] sm:$0xff] %vm622_vm1, %v605_v45 }
 0x1f2   : > { %v607_v46 = vpop.f32.mrf.mxu2 }
 0x1f3   : > { %v608_v47 = vadd.f32 %v764_v22, %v607_v46 }
 0x1f5   : > { %634 = vst.msk [vmem:[%s1003_s8 + $0x58] sm:$0xff] %vm622_vm1, %v608_v47 }
 0x200   : > { %v610_v48 = vpop.f32.mrf.mxu3 }
 0x201   : > { %v611_v36 = vadd.f32 %v764_v22, %v610_v48 }
 0x203   : > { %635 = vst.msk [vmem:[%s1003_s8 + $0x60] sm:$0xff] %vm622_vm1, %v611_v36 }
 0x208   : > { %v613_v49 = vpop.f32.mrf.mxu3 }
 0x209   : > { %v614_v50 = vadd.f32 %v764_v22, %v613_v49 }
 0x20b   : > { %636 = vst.msk [vmem:[%s1003_s8 + $0x68] sm:$0xff] %vm622_vm1, %v614_v50 }
 0x210   : > { %v616_v51 = vpop.f32.mrf.mxu3 }
 0x211   : > { %v617_v52 = vadd.f32 %v764_v22, %v616_v51 }
 0x213   : > { %637 = vst.msk [vmem:[%s1003_s8 + $0x70] sm:$0xff] %vm622_vm1, %v617_v52 }
 0x218   : > { %v619_v53 = vpop.f32.mrf.mxu3 }
 0x219   : > { %v620_v54 = vadd.f32 %v764_v22, %v619_v53 }
 0x21b   : > { %638 = vst.msk [vmem:[%s1003_s8 + $0x78] sm:$0xff] %vm622_vm1, %v620_v54 }
 0x21c PF: > { %s17_s24 = sadd.s32 1, %s771_s24  }
 0x21d   : > { %p14_p4 = scmp.ge.s32.totalorder %s17_s24, 4  }
 0x21f   :  { %16 = sbr.rel (!%p14_p4) target bundleno = 1 (0x1), region = 78 }

</bundles_post_ra>
